<compile_context>
chip_gen: v6e
topology: v6e:2x2x1
jax: 0.10.0
libtpu: 0.0.40
codegen_flags: <defaults>
</compile_context>

<pallas_src>
import jax
import jax.numpy as jnp
from jax.experimental import pallas as pl
from jax.experimental.pallas import tpu as pltpu

H1, H2, H3 = 160, 100, 100          # true Net_12 hidden widths
H1P, H2P, H3P = 256, 128, 128       # lane-padded widths (multiples of 128)


def _round_up(x, m):
    return ((x + m - 1) // m) * m


def _mlp_kernel(x_ref, w1_ref, b1_ref, w2_ref, b2_ref, w3_ref, b3_ref,
                w4_ref, b4_ref, o_ref):
    # Layer 1 (dominant): bf16 MXU matmul, f32 accumulation. Dropout == identity (eval).
    x = x_ref[...]                                                       # (TB, F) bf16
    h = jnp.dot(x, w1_ref[...], preferred_element_type=jnp.float32) + b1_ref[...]
    h = jnp.maximum(h, 0.0)                                              # (TB, 256); padded cols stay 0
    # Layers 2-4 are negligible filler; keep them fused and in f32.
    h = jnp.dot(h, w2_ref[...], preferred_element_type=jnp.float32) + b2_ref[...]
    h = jnp.maximum(h, 0.0)                                              # (TB, 128)
    h = jnp.dot(h, w3_ref[...], preferred_element_type=jnp.float32) + b3_ref[...]
    h = jnp.maximum(h, 0.0)                                              # (TB, 128)
    out = jnp.dot(h, w4_ref[...], preferred_element_type=jnp.float32) + b4_ref[...]
    o_ref[...] = out.astype(o_ref.dtype)                                 # (TB, 128) lane-dense store


def net12_forward(x, pp, n_output, *, tb_max=512):
    """x: (B, n_feature) float32; pp: padded params from pad_params()."""
    B, F = x.shape
    OP = pp["w4"].shape[1]                       # padded output width (multiple of 128)

    # Batch tile: multiple of 16 (bf16 sublane packing), capped for VMEM.
    TB = min(tb_max, _round_up(B, 16))
    B_pad = _round_up(B, TB)
    nb = B_pad // TB

    xb = x.astype(jnp.bfloat16)
    if B_pad != B:
        xb = jnp.pad(xb, ((0, B_pad - B), (0, 0)))

    w1, b1, w2, b2, w3, b3, w4, b4 = (pp[k] for k in
                                      ("w1", "b1", "w2", "b2", "w3", "b3", "w4", "b4"))

    def resident(a):  # constant index_map -> stays in VMEM across all grid steps
        return pl.BlockSpec(a.shape, lambda i: (0, 0))

    # VMEM budget: double-buffered x / out tiles + resident weights, with headroom.
    tile_bytes = 2 * (TB * F * 2 + TB * OP * 4)
    weight_bytes = sum(int(a.size * a.dtype.itemsize)
                       for a in (w1, b1, w2, b2, w3, b3, w4, b4))
    vmem_limit = min(max(tile_bytes + weight_bytes + (4 << 20), 16 << 20), 64 << 20)

    out_padded = pl.pallas_call(
        _mlp_kernel,
        out_shape=jax.ShapeDtypeStruct((B_pad, OP), jnp.float32),
        grid=(nb,),
        in_specs=[pl.BlockSpec((TB, F), lambda i: (i, 0)),
                  resident(w1), resident(b1),
                  resident(w2), resident(b2),
                  resident(w3), resident(b3),
                  resident(w4), resident(b4)],
        out_specs=pl.BlockSpec((TB, OP), lambda i: (i, 0)),
        compiler_params=pltpu.CompilerParams(
            dimension_semantics=("parallel",),
            vmem_limit_bytes=int(vmem_limit)),
    )(xb, w1, b1, w2, b2, w3, b3, w4, b4)

    return out_padded[:B, :n_output]


def init_params(key, n_feature, n_output):
    """PyTorch-Linear-like init (uniform +/- 1/sqrt(fan_in)); weights stored as (in, out)."""
    dims = [(n_feature, H1), (H1, H2), (H2, H3), (H3, n_output)]
    params = {}
    for i, (fan_in, fan_out) in enumerate(dims, start=1):
        key, kw, kb = jax.random.split(key, 3)
        bound = 1.0 / jnp.sqrt(jnp.float32(fan_in))
        params[f"w{i}"] = jax.random.uniform(
            kw, (fan_in, fan_out), jnp.float32, minval=-bound, maxval=bound)
        params[f"b{i}"] = jax.random.uniform(
            kb, (1, fan_out), jnp.float32, minval=-bound, maxval=bound)
    return params


def pad_params(p):
    """Zero-pad hidden/output dims to lane multiples; w1 cast to bf16 for the MXU.
    Padded columns/rows are exactly zero so ReLU preserves them and the final slice is exact."""
    def pad(a, rows, cols, dtype):
        out = jnp.zeros((rows, cols), dtype)
        return out.at[:a.shape[0], :a.shape[1]].set(a.astype(dtype))

    F = p["w1"].shape[0]
    OP = _round_up(max(p["w4"].shape[1], 128), 128)
    return {
        "w1": pad(p["w1"], F,   H1P, jnp.bfloat16),
        "b1": pad(p["b1"], 1,   H1P, jnp.float32),
        "w2": pad(p["w2"], H1P, H2P, jnp.float32),
        "b2": pad(p["b2"], 1,   H2P, jnp.float32),
        "w3": pad(p["w3"], H2P, H3P, jnp.float32),
        "b3": pad(p["b3"], 1,   H3P, jnp.float32),
        "w4": pad(p["w4"], H3P, OP,  jnp.float32),
        "b4": pad(p["b4"], 1,   OP,  jnp.float32),
    }


if __name__ == "__main__":
    n_feature, n_output = 32, 4
    batch = 16

    key = jax.random.PRNGKey(0)
    key, kx = jax.random.split(key)
    x = jax.random.normal(kx, (batch, n_feature), dtype=jnp.float32)
    raw = init_params(key, n_feature, n_output)
    padded = pad_params(raw)

    out = net12_forward(x, padded, n_output)
    out = jax.block_until_ready(out)

    # Reference with identical arithmetic (bf16 layer-1 operands, f32 accumulation, f32 rest).
    xb = x.astype(jnp.bfloat16)
    h = jnp.maximum(jnp.dot(xb, raw["w1"].astype(jnp.bfloat16),
                            preferred_element_type=jnp.float32) + raw["b1"], 0.0)
    h = jnp.maximum(jnp.dot(h, raw["w2"], precision=jax.lax.Precision.HIGHEST) + raw["b2"], 0.0)
    h = jnp.maximum(jnp.dot(h, raw["w3"], precision=jax.lax.Precision.HIGHEST) + raw["b3"], 0.0)
    ref = jnp.dot(h, raw["w4"], precision=jax.lax.Precision.HIGHEST) + raw["b4"]

    assert out.shape == (batch, n_output)
    assert jnp.allclose(out, ref, atol=1e-3, rtol=1e-3), float(jnp.max(jnp.abs(out - ref)))

    print("KERNEL_OK")
</pallas_src>

<mosaic_0001>
module attributes {stable_mosaic.version = 11 : i64} {
  func.func @_mlp_kernel(%arg0: i32, %arg1: memref<16x32xbf16, #tpu.memory_space<vmem>>, %arg2: memref<32x256xbf16, #tpu.memory_space<vmem>>, %arg3: memref<1x256xf32, #tpu.memory_space<vmem>>, %arg4: memref<256x128xf32, #tpu.memory_space<vmem>>, %arg5: memref<1x128xf32, #tpu.memory_space<vmem>>, %arg6: memref<128x128xf32, #tpu.memory_space<vmem>>, %arg7: memref<1x128xf32, #tpu.memory_space<vmem>>, %arg8: memref<128x128xf32, #tpu.memory_space<vmem>>, %arg9: memref<1x128xf32, #tpu.memory_space<vmem>>, %arg10: memref<16x128xf32, #tpu.memory_space<vmem>>) attributes {dimension_semantics = [#tpu.dimension_semantics<parallel>], iteration_bounds = array<i64: 1>, scalar_prefetch = 0 : i64, scratch_operands = 0 : i64, tpu.core_type = #tpu.core_type<tc>, window_params = [{transform_indices = @transform_0, window_bounds = array<i64: 16, 32>}, {pipeline_mode = #tpu.pipeline_mode<synchronous>, transform_indices = @transform_1, window_bounds = array<i64: 32, 256>}, {pipeline_mode = #tpu.pipeline_mode<synchronous>, transform_indices = @transform_2, window_bounds = array<i64: 1, 256>}, {pipeline_mode = #tpu.pipeline_mode<synchronous>, transform_indices = @transform_3, window_bounds = array<i64: 256, 128>}, {pipeline_mode = #tpu.pipeline_mode<synchronous>, transform_indices = @transform_4, window_bounds = array<i64: 1, 128>}, {pipeline_mode = #tpu.pipeline_mode<synchronous>, transform_indices = @transform_5, window_bounds = array<i64: 128, 128>}, {pipeline_mode = #tpu.pipeline_mode<synchronous>, transform_indices = @transform_6, window_bounds = array<i64: 1, 128>}, {pipeline_mode = #tpu.pipeline_mode<synchronous>, transform_indices = @transform_7, window_bounds = array<i64: 128, 128>}, {pipeline_mode = #tpu.pipeline_mode<synchronous>, transform_indices = @transform_8, window_bounds = array<i64: 1, 128>}, {transform_indices = @transform_9, window_bounds = array<i64: 16, 128>}]} {
    %c0 = arith.constant 0 : index
    %c0_0 = arith.constant 0 : index
    %0 = vector.load %arg1[%c0, %c0_0] : memref<16x32xbf16, #tpu.memory_space<vmem>>, vector<16x32xbf16>
    %c0_1 = arith.constant 0 : index
    %c0_2 = arith.constant 0 : index
    %1 = vector.load %arg2[%c0_1, %c0_2] : memref<32x256xbf16, #tpu.memory_space<vmem>>, vector<32x256xbf16>
    %cst = arith.constant dense<0.000000e+00> : vector<16x256xf32>
    %2 = tpu.matmul %0, %1, %cst {dimension_numbers = #tpu.dot_dimension_numbers<[1], [0], [0], [1], [0, 0, 1, 1], [], []>} : vector<16x32xbf16>, vector<32x256xbf16>, vector<16x256xf32> -> vector<16x256xf32>
    %c0_3 = arith.constant 0 : index
    %c0_4 = arith.constant 0 : index
    %3 = vector.load %arg3[%c0_3, %c0_4] : memref<1x256xf32, #tpu.memory_space<vmem>>, vector<1x256xf32>
    %4 = vector.broadcast %3 : vector<1x256xf32> to vector<16x256xf32>
    %5 = arith.addf %2, %4 : vector<16x256xf32>
    %cst_5 = arith.constant 0.000000e+00 : f32
    %6 = vector.broadcast %cst_5 : f32 to vector<16x256xf32>
    %7 = arith.maximumf %5, %6 : vector<16x256xf32>
    %c0_6 = arith.constant 0 : index
    %c0_7 = arith.constant 0 : index
    %8 = vector.load %arg4[%c0_6, %c0_7] : memref<256x128xf32, #tpu.memory_space<vmem>>, vector<256x128xf32>
    %cst_8 = arith.constant dense<0.000000e+00> : vector<16x128xf32>
    %9 = tpu.matmul %7, %8, %cst_8 {dimension_numbers = #tpu.dot_dimension_numbers<[1], [0], [0], [1], [0, 0, 1, 1], [], []>} : vector<16x256xf32>, vector<256x128xf32>, vector<16x128xf32> -> vector<16x128xf32>
    %c0_9 = arith.constant 0 : index
    %c0_10 = arith.constant 0 : index
    %10 = vector.load %arg5[%c0_9, %c0_10] : memref<1x128xf32, #tpu.memory_space<vmem>>, vector<1x128xf32>
    %11 = vector.broadcast %10 : vector<1x128xf32> to vector<16x128xf32>
    %12 = arith.addf %9, %11 : vector<16x128xf32>
    %cst_11 = arith.constant 0.000000e+00 : f32
    %13 = vector.broadcast %cst_11 : f32 to vector<16x128xf32>
    %14 = arith.maximumf %12, %13 : vector<16x128xf32>
    %c0_12 = arith.constant 0 : index
    %c0_13 = arith.constant 0 : index
    %15 = vector.load %arg6[%c0_12, %c0_13] : memref<128x128xf32, #tpu.memory_space<vmem>>, vector<128x128xf32>
    %cst_14 = arith.constant dense<0.000000e+00> : vector<16x128xf32>
    %16 = tpu.matmul %14, %15, %cst_14 {dimension_numbers = #tpu.dot_dimension_numbers<[1], [0], [0], [1], [0, 0, 1, 1], [], []>} : vector<16x128xf32>, vector<128x128xf32>, vector<16x128xf32> -> vector<16x128xf32>
    %c0_15 = arith.constant 0 : index
    %c0_16 = arith.constant 0 : index
    %17 = vector.load %arg7[%c0_15, %c0_16] : memref<1x128xf32, #tpu.memory_space<vmem>>, vector<1x128xf32>
    %18 = vector.broadcast %17 : vector<1x128xf32> to vector<16x128xf32>
    %19 = arith.addf %16, %18 : vector<16x128xf32>
    %cst_17 = arith.constant 0.000000e+00 : f32
    %20 = vector.broadcast %cst_17 : f32 to vector<16x128xf32>
    %21 = arith.maximumf %19, %20 : vector<16x128xf32>
    %c0_18 = arith.constant 0 : index
    %c0_19 = arith.constant 0 : index
    %22 = vector.load %arg8[%c0_18, %c0_19] : memref<128x128xf32, #tpu.memory_space<vmem>>, vector<128x128xf32>
    %cst_20 = arith.constant dense<0.000000e+00> : vector<16x128xf32>
    %23 = tpu.matmul %21, %22, %cst_20 {dimension_numbers = #tpu.dot_dimension_numbers<[1], [0], [0], [1], [0, 0, 1, 1], [], []>} : vector<16x128xf32>, vector<128x128xf32>, vector<16x128xf32> -> vector<16x128xf32>
    %c0_21 = arith.constant 0 : index
    %c0_22 = arith.constant 0 : index
    %24 = vector.load %arg9[%c0_21, %c0_22] : memref<1x128xf32, #tpu.memory_space<vmem>>, vector<1x128xf32>
    %25 = vector.broadcast %24 : vector<1x128xf32> to vector<16x128xf32>
    %26 = arith.addf %23, %25 : vector<16x128xf32>
    %c0_23 = arith.constant 0 : index
    %c0_24 = arith.constant 0 : index
    %27 = vector.load %arg10[%c0_23, %c0_24] : memref<16x128xf32, #tpu.memory_space<vmem>>, vector<16x128xf32>
    tpu.vector_store %arg10[%c0_23, %c0_24], %26 {strides = array<i32>} : memref<16x128xf32, #tpu.memory_space<vmem>>, vector<16x128xf32>,
    return
  }
  func.func @transform_0(%arg0: i32) -> (i32, i32) {
    %c0_i32 = arith.constant 0 : i32
    %c0_i32_0 = arith.constant 0 : i32
    return %arg0, %c0_i32 : i32, i32
  }
  func.func @transform_1(%arg0: i32) -> (i32, i32) {
    %c0_i32 = arith.constant 0 : i32
    %c0_i32_0 = arith.constant 0 : i32
    %c0_i32_1 = arith.constant 0 : i32
    return %c0_i32, %c0_i32_0 : i32, i32
  }
  func.func @transform_2(%arg0: i32) -> (i32, i32) {
    %c0_i32 = arith.constant 0 : i32
    %c0_i32_0 = arith.constant 0 : i32
    %c0_i32_1 = arith.constant 0 : i32
    return %c0_i32, %c0_i32_0 : i32, i32
  }
  func.func @transform_3(%arg0: i32) -> (i32, i32) {
    %c0_i32 = arith.constant 0 : i32
    %c0_i32_0 = arith.constant 0 : i32
    %c0_i32_1 = arith.constant 0 : i32
    return %c0_i32, %c0_i32_0 : i32, i32
  }
  func.func @transform_4(%arg0: i32) -> (i32, i32) {
    %c0_i32 = arith.constant 0 : i32
    %c0_i32_0 = arith.constant 0 : i32
    %c0_i32_1 = arith.constant 0 : i32
    return %c0_i32, %c0_i32_0 : i32, i32
  }
  func.func @transform_5(%arg0: i32) -> (i32, i32) {
    %c0_i32 = arith.constant 0 : i32
    %c0_i32_0 = arith.constant 0 : i32
    %c0_i32_1 = arith.constant 0 : i32
    return %c0_i32, %c0_i32_0 : i32, i32
  }
  func.func @transform_6(%arg0: i32) -> (i32, i32) {
    %c0_i32 = arith.constant 0 : i32
    %c0_i32_0 = arith.constant 0 : i32
    %c0_i32_1 = arith.constant 0 : i32
    return %c0_i32, %c0_i32_0 : i32, i32
  }
  func.func @transform_7(%arg0: i32) -> (i32, i32) {
    %c0_i32 = arith.constant 0 : i32
    %c0_i32_0 = arith.constant 0 : i32
    %c0_i32_1 = arith.constant 0 : i32
    return %c0_i32, %c0_i32_0 : i32, i32
  }
  func.func @transform_8(%arg0: i32) -> (i32, i32) {
    %c0_i32 = arith.constant 0 : i32
    %c0_i32_0 = arith.constant 0 : i32
    %c0_i32_1 = arith.constant 0 : i32
    return %c0_i32, %c0_i32_0 : i32, i32
  }
  func.func @transform_9(%arg0: i32) -> (i32, i32) {
    %c0_i32 = arith.constant 0 : i32
    %c0_i32_0 = arith.constant 0 : i32
    return %arg0, %c0_i32 : i32, i32
  }
}

</mosaic_0001>

<bundles_post_ra>
// kernel: tpu_custom_call.1
= control target key start
LH: loop header
LB: loop body
LE: loop exit
PB: predicated region body
PF: predicated region fallthrough
CT: control target
= control target key end

     0   :  { %14 = vsyncpa [#allocation3], 0  ;;  %s936_s0 = inlined_call_operand.hbm [shape: bf16[16,32], index: 0, kind: input, shape index: {}]   ;;  %s937_s1 = inlined_call_operand.hbm [shape: bf16[32,256], index: 1, kind: input, shape index: {}]   ;;  %s938_s2 = inlined_call_operand.vmem [shape: f32[1,256], index: 2, kind: input, shape index: {}]   ;;  %s939_s3 = inlined_call_operand.hbm [shape: f32[256,128], index: 3, kind: input, shape index: {}]   ;;  %s940_s4 = inlined_call_operand.vmem [shape: f32[1,128], index: 4, kind: input, shape index: {}]   ;;  %s941_s5 = inlined_call_operand.hbm [shape: f32[128,128], index: 5, kind: input, shape index: {}]   ;;  %s942_s6 = inlined_call_operand.vmem [shape: f32[1,128], index: 6, kind: input, shape index: {}]   ;;  %s943_s7 = inlined_call_operand.hbm [shape: f32[128,128], index: 7, kind: input, shape index: {}]   ;;  %s944_s8 = inlined_call_operand.vmem [shape: f32[1,128], index: 8, kind: input, shape index: {}]   ;;  %s945_s9 = inlined_call_operand.hbm [shape: f32[16,128], index: 9, kind: output, shape index: {}]  }
   0x1   :  { %15 = vsyncpa [#allocation6], 0 }
   0x2   :  { %16 = vsyncpa [#allocation9], 0 }
   0x3   :  { %17 = vsyncpa [#allocation4], 0  ;;  %s830_s30 = smov [#allocation5]  }
   0x4   :  { %s35_s10 = sshll.u32 %s830_s30, 4  ;;  %s36_s10 = int_to_ptr.vmem [resolvable:$true] %s35_s10 }
   0x5   :  { %s710_s11 = scalar_lea.vmem %s36_s10, 512  ;;  %p715_p1 = scmp.lt.s32.totalorder %s36_s10, %s36_s10 }
   0x6   :  { %p711_p0 = scmp.ne.s32.totalorder %s36_s10, %s710_s11  ;;  %p716_p2 = scmp.lt.s32.totalorder %s710_s11, %s710_s11 }
   0x8   :  { %p717_p3 = por %p716_p2, %p715_p1 }
   0xa   :  { %p718_p4 = pnand %p717_p3, %p711_p0 }
   0xc   :  { %721 = shalt.err (!%p718_p4)
}
   0xd   :  { %s831_s12 = smov 128   ;;  %s832_s13 = smov 8  }
   0xe   :  { %41 = dma.hbm_to_vmem [thread:$0]  %s937_s1, 512, %s36_s10, [#allocation6], %s831_s12, %s831_s12, %s832_s13  }
   0xf   :  { %s833_s16 = smov [#allocation8]   ;;  %s834_s18 = smov [#allocation2]  }
  0x10   :  { %s63_s17 = sshll.u32 %s833_s16, 4  ;;  %s23_s19 = sshll.u32 %s834_s18, 4  ;;  %s64_s17 = int_to_ptr.vmem [resolvable:$true] %s63_s17  ;;  %s24_s19 = int_to_ptr.vmem [resolvable:$true] %s23_s19 }
  0x11   :  { %s730_s20 = scalar_lea.vmem %s64_s17, 2048  ;;  %p735_p6 = scmp.lt.s32.totalorder %s64_s17, %s64_s17 }
  0x12   :  { %p731_p5 = scmp.ne.s32.totalorder %s64_s17, %s730_s20  ;;  %p736_p7 = scmp.lt.s32.totalorder %s730_s20, %s730_s20 }
  0x14   :  { %p737_p8 = por %p736_p7, %p735_p6 }
  0x16   :  { %p738_p9 = pnand %p737_p8, %p731_p5 }
  0x18   :  { %741 = shalt.err (!%p738_p9)
}
  0x19   :  { %69 = dma.hbm_to_vmem [thread:$0]  %s941_s5, 2048, %s64_s17, [#allocation9], %s831_s12, %s831_s12, %s832_s13  }
  0x1a   :  { %s750_s1 = scalar_lea.vmem %s24_s19, 128  ;;  %p755_p11 = scmp.lt.s32.totalorder %s24_s19, %s24_s19 }
  0x1b   :  { %p751_p10 = scmp.ne.s32.totalorder %s24_s19, %s750_s1  ;;  %p756_p12 = scmp.lt.s32.totalorder %s750_s1, %s750_s1 }
  0x1d   :  { %p757_p13 = por %p756_p12, %p755_p11 }
  0x1f   :  { %p758_p0 = pnand %p757_p13, %p751_p10 }
  0x21   :  { %761 = shalt.err (!%p758_p0)
}
  0x22   :  { %s835_s23 = smov 64   ;;  %s836_s24 = smov 4  }
  0x23   :  { %29 = dma.hbm_to_vmem [thread:$0]  %s936_s0, 128, %s24_s19, [#allocation3], %s835_s23, %s835_s23, %s836_s24  }
  0x24   :  { %s837_s27 = smov [#allocation7]   ;;  %s838_s29 = smov [#allocation10]  }
  0x25   :  { %s49_s28 = sshll.u32 %s837_s27, 4  ;;  %s77_s30 = sshll.u32 %s838_s29, 4  ;;  %s50_s28 = int_to_ptr.vmem [resolvable:$true] %s49_s28  ;;  %s78_s30 = int_to_ptr.vmem [resolvable:$true] %s77_s30 }
  0x26   :  { %s770_s5 = scalar_lea.vmem %s50_s28, 4096  ;;  %p775_p2 = scmp.lt.s32.totalorder %s50_s28, %s50_s28 }
  0x27   :  { %p771_p1 = scmp.ne.s32.totalorder %s50_s28, %s770_s5  ;;  %p776_p3 = scmp.lt.s32.totalorder %s770_s5, %s770_s5 }
  0x29   :  { %p777_p4 = por %p776_p3, %p775_p2 }
  0x2b   :  { %p778_p5 = pnand %p777_p4, %p771_p1 }
  0x2d   :  { %781 = shalt.err (!%p778_p5)
}
  0x2e   :  { %55 = dma.hbm_to_vmem [thread:$0]  %s939_s3, 4096, %s50_s28, [#allocation6], %s831_s12, %s831_s12, %s832_s13  }
  0x2f   :  { %s790_s0 = scalar_lea.vmem %s78_s30, 2048  ;;  %p795_p7 = scmp.lt.s32.totalorder %s78_s30, %s78_s30 }
  0x30   :  { %p791_p6 = scmp.ne.s32.totalorder %s78_s30, %s790_s0  ;;  %p796_p8 = scmp.lt.s32.totalorder %s790_s0, %s790_s0 }
  0x32   :  { %p797_p9 = por %p796_p8, %p795_p7 }
  0x34   :  { %p798_p10 = pnand %p797_p9, %p791_p6 }
  0x36   :  { %801 = shalt.err (!%p798_p10)
}
  0x37   :  { %83 = dma.hbm_to_vmem [thread:$0]  %s943_s7, 2048, %s78_s30, [#allocation9], %s831_s12, %s831_s12, %s832_s13  }
  0x38   :  { %822 = dma.done.wait [#allocation3], 128  }
  0x39   :  { %823 = vsyncadd [#allocation3], 4294967168 }
  0x3a   :  { %824 = dma.done.wait [#allocation6], 4608  }
  0x3b   :  { %825 = vsyncadd [#allocation6], 4294962688 }
  0x3c   :  { %826 = dma.done.wait [#allocation9], 4096  }
  0x3d   :  { %827 = vsyncadd [#allocation9], 4294963200  ;;  %v839_v0 = vmov 0   ;;  %v695_v1 = vld [vmem:[#allocation5 + $0x14] ss:$8 sps:$4 sm:$0xff]   ;;  %v225_v9 = vld [vmem:[#allocation7 + $0xe8] sm:$0xff]  ;;  %v110_v48 = vlaneseq }
  0x3e   :  { %181 = vmatprep.mubr.bf16.mxu0 %v839_v0  ;;  %v697_v2 = vld [vmem:[#allocation5 + $0x10] ss:$8 sps:$4 sm:$0xff]   ;;  %161 = vmatprep.subr.bf16.mxu0 %v695_v1  ;;  %v698_v3 = vld [vmem:[#allocation5 + $0x4] ss:$8 sps:$4 sm:$0xff]   ;;  %v700_v4 = vld [vmem:[#allocation5] ss:$8 sps:$4 sm:$0xff]  }
  0x3f   :  { %162 = vmatpush1.bf16.msra.mxu0 %v697_v2  ;;  %v227_v5 = vld [vmem:[#allocation7 + $0xf8] sm:$0xff]  ;;  %v226_v7 = vld [vmem:[#allocation7 + $0xf0] sm:$0xff]  ;;  %v209_v11 = vld [vmem:[#allocation7 + $0x68] sm:$0xff]  ;;  %vm145_vm0 = vcmask 261120   ;;  %v111_v49 = vshrl.u32 %v110_v48, 7  ;;  %s840_s20 = smov [#allocation11]  }
  0x40   :  { %163 = vmatprep.subr.bf16.mxu0 %v698_v3  ;;  %540 = vmatprep.subr.mxu1 %v227_v5  ;;  %v211_v6 = vld [vmem:[#allocation7 + $0x78] sm:$0xff]  ;;  %v210_v8 = vld [vmem:[#allocation7 + $0x70] sm:$0xff]  ;;  %v224_v12 = vld [vmem:[#allocation7 + $0xe0] sm:$0xff]  ;;  %s517_s21 = sshll.u32 %s840_s20, 4  ;;  %s518_s21 = int_to_ptr.vmem [resolvable:$true] %s517_s21 }
  0x41   :  { %541 = vmatpush3.msra.mxu1 %v211_v6  ;;  %v701_v10 = vld [vmem:[#allocation2] sm:$0xff]   ;;  %v208_v13 = vld [vmem:[#allocation7 + $0x60] sm:$0xff]  ;;  %v222_v16 = vld [vmem:[#allocation7 + $0xd0] sm:$0xff]  ;;  %v112_v50 = vsub.s32 0, %v111_v49  ;;  %v116_v52 = vsub.s32 1, %v111_v49  ;;  %p807_p12 = scmp.lt.s32.totalorder %s518_s21, %s518_s21 }
  0x42   :  { %542 = vmatprep.subr.mxu1 %v226_v7  ;;  %v223_v14 = vld [vmem:[#allocation7 + $0xd8] sm:$0xff]  ;;  %v206_v17 = vld [vmem:[#allocation7 + $0x50] sm:$0xff]  ;;  %v221_v18 = vld [vmem:[#allocation7 + $0xc8] sm:$0xff] }
  0x43   :  { %164 = vmatpush1.bf16.msra.mxu0 %v700_v4  ;;  %543 = vmatpush3.msra.mxu1 %v210_v8  ;;  %v207_v15 = vld [vmem:[#allocation7 + $0x58] sm:$0xff]  ;;  %v205_v19 = vld [vmem:[#allocation7 + $0x48] sm:$0xff]  ;;  %v220_v20 = vld [vmem:[#allocation7 + $0xc0] sm:$0xff] }
  0x44   :  { %544 = vmatprep.subr.mxu1 %v225_v9  ;;  %v204_v21 = vld [vmem:[#allocation7 + $0x40] sm:$0xff]  ;;  %v219_v22 = vld [vmem:[#allocation7 + $0xb8] sm:$0xff]  ;;  %v218_v24 = vld [vmem:[#allocation7 + $0xb0] sm:$0xff] }
  0x45   :  { %545 = vmatpush3.msra.mxu1 %v209_v11  ;;  %v203_v23 = vld [vmem:[#allocation7 + $0x38] sm:$0xff]  ;;  %v202_v25 = vld [vmem:[#allocation7 + $0x30] sm:$0xff]  ;;  %v217_v26 = vld [vmem:[#allocation7 + $0xa8] sm:$0xff] }
  0x46   :  { %536 = vmatmul.mubr.msk.bf16.vlgmr.msra.gmra.mxu0 %vm145_vm0, %v701_v10  ;;  %546 = vmatprep.subr.mxu1 %v224_v12  ;;  %v201_v27 = vld [vmem:[#allocation7 + $0x28] sm:$0xff]  ;;  %v216_v28 = vld [vmem:[#allocation7 + $0xa0] sm:$0xff]  ;;  %v215_v30 = vld [vmem:[#allocation7 + $0x98] sm:$0xff] }
  0x47   :  { %547 = vmatpush3.msra.mxu1 %v208_v13  ;;  %v200_v29 = vld [vmem:[#allocation7 + $0x20] sm:$0xff]  ;;  %v199_v31 = vld [vmem:[#allocation7 + $0x18] sm:$0xff]  ;;  %v214_v32 = vld [vmem:[#allocation7 + $0x90] sm:$0xff] }
  0x48   :  { %548 = vmatprep.subr.mxu1 %v223_v14  ;;  %v198_v33 = vld [vmem:[#allocation7 + $0x10] sm:$0xff]  ;;  %v213_v34 = vld [vmem:[#allocation7 + $0x88] sm:$0xff]  ;;  %v212_v36 = vld [vmem:[#allocation7 + $0x80] sm:$0xff] }
  0x49   :  { %549 = vmatpush3.msra.mxu1 %v207_v15  ;;  %v197_v35 = vld [vmem:[#allocation7 + $0x8] sm:$0xff]  ;;  %v196_v37 = vld [vmem:[#allocation7] sm:$0xff]  ;;  %v327_v38 = vld [vmem:[#allocation8 + $0x78] sm:$0xff] }
  0x4a   :  { %550 = vmatprep.subr.mxu1 %v222_v16  ;;  %v326_v39 = vld [vmem:[#allocation8 + $0x70] sm:$0xff]  ;;  %614 = vmatprep.subr.mxu0 %v327_v38  ;;  %v325_v40 = vld [vmem:[#allocation8 + $0x68] sm:$0xff]  ;;  %v324_v41 = vld [vmem:[#allocation8 + $0x60] sm:$0xff] }
  0x4b   :  { %551 = vmatpush3.msra.mxu1 %v206_v17  ;;  %615 = vmatpush3.msra.mxu0 %v327_v38  ;;  %v323_v42 = vld [vmem:[#allocation8 + $0x58] sm:$0xff]  ;;  %v322_v43 = vld [vmem:[#allocation8 + $0x50] sm:$0xff]  ;;  %v321_v44 = vld [vmem:[#allocation8 + $0x48] sm:$0xff] }
  0x4c   :  { %552 = vmatprep.subr.mxu1 %v221_v18  ;;  %616 = vmatprep.subr.mxu0 %v326_v39  ;;  %v320_v45 = vld [vmem:[#allocation8 + $0x40] sm:$0xff]  ;;  %v319_v46 = vld [vmem:[#allocation8 + $0x38] sm:$0xff]  ;;  %v318_v47 = vld [vmem:[#allocation8 + $0x30] sm:$0xff] }
  0x4d   :  { %553 = vmatpush3.msra.mxu1 %v205_v19  ;;  %617 = vmatpush3.msra.mxu0 %v326_v39  ;;  %v108_v51 = vld [vmem:[%s938_s2] sm:$0x3]  ;;  %v317_v3 = vld [vmem:[#allocation8 + $0x28] sm:$0xff]  ;;  %v316_v4 = vld [vmem:[#allocation8 + $0x20] sm:$0xff] }
  0x4e   :  { %554 = vmatprep.subr.mxu1 %v220_v20  ;;  %618 = vmatprep.subr.mxu0 %v325_v40  ;;  %v113_v53 = vrot.slane %v108_v51, %v112_v50  ;;  %v117_v54 = vrot.slane %v108_v51, %v116_v52  ;;  %v315_v5 = vld [vmem:[#allocation8 + $0x18] sm:$0xff]  ;;  %v314_v6 = vld [vmem:[#allocation8 + $0x10] sm:$0xff]  ;;  %v313_v7 = vld [vmem:[#allocation8 + $0x8] sm:$0xff] }
  0x4f   :  { %555 = vmatpush3.msra.mxu1 %v204_v21  ;;  %619 = vmatpush3.msra.mxu0 %v325_v40  ;;  %v312_v8 = vld [vmem:[#allocation8] sm:$0xff]  ;;  %v427_v9 = vld [vmem:[#allocation10 + $0x78] sm:$0xff]  ;;  %v426_v10 = vld [vmem:[#allocation10 + $0x70] sm:$0xff] }
  0x50   :  { %556 = vmatprep.subr.mxu1 %v219_v22  ;;  %620 = vmatprep.subr.mxu0 %v324_v41  ;;  %v425_v11 = vld [vmem:[#allocation10 + $0x68] sm:$0xff]  ;;  %v424_v12 = vld [vmem:[#allocation10 + $0x60] sm:$0xff]  ;;  %v423_v13 = vld [vmem:[#allocation10 + $0x58] sm:$0xff] }
  0x51   :  { %557 = vmatpush3.msra.mxu1 %v203_v23  ;;  %621 = vmatpush3.msra.mxu0 %v324_v41  ;;  %v422_v14 = vld [vmem:[#allocation10 + $0x50] sm:$0xff]  ;;  %v421_v15 = vld [vmem:[#allocation10 + $0x48] sm:$0xff]  ;;  %v420_v16 = vld [vmem:[#allocation10 + $0x40] sm:$0xff] }
  0x52   :  { %558 = vmatprep.subr.mxu1 %v218_v24  ;;  %622 = vmatprep.subr.mxu0 %v323_v42  ;;  %v419_v17 = vld [vmem:[#allocation10 + $0x38] sm:$0xff]  ;;  %v418_v18 = vld [vmem:[#allocation10 + $0x30] sm:$0xff]  ;;  %v417_v19 = vld [vmem:[#allocation10 + $0x28] sm:$0xff] }
  0x53   :  { %559 = vmatpush3.msra.mxu1 %v202_v25  ;;  %623 = vmatpush3.msra.mxu0 %v323_v42  ;;  %v416_v20 = vld [vmem:[#allocation10 + $0x20] sm:$0xff]  ;;  %v537_v22 = vld [vmem:[%s940_s4] ss:$0 sm:$0xff] }
  0x54   :  { %560 = vmatprep.subr.mxu1 %v217_v26  ;;  %624 = vmatprep.subr.mxu0 %v322_v43 }
  0x55   :  { %561 = vmatpush3.msra.mxu1 %v201_v27  ;;  %625 = vmatpush3.msra.mxu0 %v322_v43  ;;  %v539_v43 = vld [vmem:[%s944_s8] ss:$0 sm:$0xff] }
  0x56   :  { %562 = vmatprep.subr.mxu1 %v216_v28  ;;  %626 = vmatprep.subr.mxu0 %v321_v44 }
  0x57   :  { %563 = vmatpush3.msra.mxu1 %v200_v29  ;;  %627 = vmatpush3.msra.mxu0 %v321_v44 }
  0x58   :  { %564 = vmatprep.subr.mxu1 %v215_v30  ;;  %628 = vmatprep.subr.mxu0 %v320_v45 }
  0x59   :  { %565 = vmatpush3.msra.mxu1 %v199_v31  ;;  %629 = vmatpush3.msra.mxu0 %v320_v45 }
  0x5a   :  { %566 = vmatprep.subr.mxu1 %v214_v32  ;;  %630 = vmatprep.subr.mxu0 %v319_v46  ;;  %v415_v32 = vld [vmem:[#allocation10 + $0x18] sm:$0xff] }
  0x5b   :  { %567 = vmatpush3.msra.mxu1 %v198_v33  ;;  %631 = vmatpush3.msra.mxu0 %v319_v46  ;;  %v414_v33 = vld [vmem:[#allocation10 + $0x10] sm:$0xff] }
  0x5c   :  { %568 = vmatprep.subr.mxu1 %v213_v34  ;;  %632 = vmatprep.subr.mxu0 %v318_v47  ;;  %v413_v34 = vld [vmem:[#allocation10 + $0x8] sm:$0xff] }
  0x5d   :  { %569 = vmatpush3.msra.mxu1 %v197_v35  ;;  %633 = vmatpush3.msra.mxu0 %v318_v47  ;;  %v412_v35 = vld [vmem:[#allocation10] sm:$0xff] }
  0x5e   :  { %570 = vmatprep.subr.mxu1 %v212_v36  ;;  %634 = vmatprep.subr.mxu0 %v317_v3  ;;  %v538_v36 = vld [vmem:[%s942_s6] ss:$0 sm:$0xff]  ;;  %s802_s6 = scalar_lea.vmem %s518_s21, 256 }
  0x5f   :  { %571 = vmatpush3.msra.mxu1 %v196_v37  ;;  %635 = vmatpush3.msra.mxu0 %v317_v3  ;;  %p803_p11 = scmp.ne.s32.totalorder %s518_s21, %s802_s6  ;;  %p808_p13 = scmp.lt.s32.totalorder %s802_s6, %s802_s6 }
  0x60   :  { %636 = vmatprep.subr.mxu0 %v316_v4  ;;  %649 = vmatprep.subr.mxu1 %v427_v9 }
  0x61   :  { %637 = vmatpush3.msra.mxu0 %v316_v4  ;;  %p809_p0 = por %p808_p13, %p807_p12 }
  0x62   :  { %638 = vmatprep.subr.mxu0 %v315_v5 }
  0x63   :  { %639 = vmatpush3.msra.mxu0 %v315_v5  ;;  %p810_p1 = pnand %p809_p0, %p803_p11 }
  0x64   :  { %640 = vmatprep.subr.mxu0 %v314_v6 }
  0x65   :  { %641 = vmatpush3.msra.mxu0 %v314_v6 }
  0x66   :  { %642 = vmatprep.subr.mxu0 %v313_v7 }
  0x67   :  { %643 = vmatpush3.msra.mxu0 %v313_v7 }
  0x68   :  { %644 = vmatprep.subr.mxu0 %v312_v8 }
  0x69   :  { %645 = vmatpush3.msra.mxu0 %v312_v8 }
 0x106   :  { %v183_v55 = vpop.f32.mrf.mxu0 }
 0x107   :  { %v184_v56 = vadd.f32 %v183_v55, %v113_v53 }
 0x108   :  { %v185_v57 = vpop.f32.mrf.mxu0 }
 0x109   :  { %v186_v58 = vadd.f32 %v185_v57, %v117_v54  ;;  %v192_v61 = vmax.f32 %v184_v56, 0.0 }
 0x10a   :  { %v187_v59 = vpop.f32.mrf.mxu0 }
 0x10b   :  { %v193_v60 = vmax.f32 %v186_v58, 0.0  ;;  %v188_v62 = vadd.f32 %v187_v59, %v113_v53 }
 0x10c   :  { %v189_v63 = vpop.f32.mrf.mxu0 }
 0x10d   :  { %v190_v0 = vadd.f32 %v189_v63, %v117_v54  ;;  %299 = vmatprep.mubr.f32.mxu1 %v193_v60  ;;  %v194_v2 = vmax.f32 %v188_v62, 0.0 }
 0x10e   :  { %300 = vmatmul.mubr.f32.vlgmr.msra.gmra.mxu1 %v192_v61 }
 0x10f   :  { %v195_v1 = vmax.f32 %v190_v0, 0.0  ;;  %650 = vmatpush3.msra.mxu1 %v427_v9 }
 0x110   :  { %651 = vmatprep.subr.mxu1 %v426_v10 }
 0x111   :  { %304 = vmatprep.mubr.f32.mxu1 %v195_v1  ;;  %652 = vmatpush3.msra.mxu1 %v426_v10 }
 0x112   :  { %305 = vmatmul.mubr.f32.gmra.mxu1 %v194_v2  ;;  %653 = vmatprep.subr.mxu1 %v425_v11 }
 0x113   :  { %654 = vmatpush3.msra.mxu1 %v425_v11 }
 0x114   :  { %655 = vmatprep.subr.mxu1 %v424_v12 }
 0x115   :  { %656 = vmatpush3.msra.mxu1 %v424_v12 }
 0x116   :  { %657 = vmatprep.subr.mxu1 %v423_v13 }
 0x117   :  { %658 = vmatpush3.msra.mxu1 %v423_v13 }
 0x118   :  { %659 = vmatprep.subr.mxu1 %v422_v14 }
 0x119   :  { %660 = vmatpush3.msra.mxu1 %v422_v14 }
 0x11a   :  { %661 = vmatprep.subr.mxu1 %v421_v15 }
 0x11b   :  { %662 = vmatpush3.msra.mxu1 %v421_v15 }
 0x11c   :  { %663 = vmatprep.subr.mxu1 %v420_v16 }
 0x11d   :  { %664 = vmatpush3.msra.mxu1 %v420_v16 }
 0x11e   :  { %665 = vmatprep.subr.mxu1 %v419_v17 }
 0x11f   :  { %666 = vmatpush3.msra.mxu1 %v419_v17 }
 0x120   :  { %667 = vmatprep.subr.mxu1 %v418_v18 }
 0x121   :  { %668 = vmatpush3.msra.mxu1 %v418_v18 }
 0x122   :  { %669 = vmatprep.subr.mxu1 %v417_v19 }
 0x123   :  { %670 = vmatpush3.msra.mxu1 %v417_v19 }
 0x124   :  { %671 = vmatprep.subr.mxu1 %v416_v20 }
 0x125   :  { %672 = vmatpush3.msra.mxu1 %v416_v20 }
 0x126   :  { %673 = vmatprep.subr.mxu1 %v415_v32 }
 0x127   :  { %674 = vmatpush3.msra.mxu1 %v415_v32 }
 0x128   :  { %675 = vmatprep.subr.mxu1 %v414_v33 }
 0x129   :  { %676 = vmatpush3.msra.mxu1 %v414_v33 }
 0x12a   :  { %677 = vmatprep.subr.mxu1 %v413_v34 }
 0x12b   :  { %678 = vmatpush3.msra.mxu1 %v413_v34 }
 0x12c   :  { %679 = vmatprep.subr.mxu1 %v412_v35 }
 0x12d   :  { %680 = vmatpush3.msra.mxu1 %v412_v35 }
 0x1ce   :  { %v572_v21 = vpop.f32.mrf.mxu1 }
 0x1d0   :  { %v573_v23 = vpop.f32.mrf.mxu1 }
 0x1d1   :  { %v574_v24 = vadd.f32 %v573_v23, %v572_v21 }
 0x1d2   :  { %v575_v25 = vpop.f32.mrf.mxu1 }
 0x1d3   :  { %v302_v26 = vadd.f32 %v574_v24, %v537_v22 }
 0x1d4   :  { %v576_v27 = vpop.f32.mrf.mxu1 }
 0x1d5   :  { %v310_v28 = vmax.f32 %v302_v26, 0.0  ;;  %v577_v29 = vadd.f32 %v576_v27, %v575_v25 }
 0x1d7   :  { %v307_v30 = vadd.f32 %v577_v29, %v537_v22  ;;  %646 = vmatprep.mubr.f32.mxu0 %v310_v28 }
 0x1d9   :  { %v311_v31 = vmax.f32 %v307_v30, 0.0 }
 0x1db   :  { %647 = vmatmul.mubr.f32.vlgmr.msra.gmra.mxu0 %v311_v31 }
 0x29b   :  { %v648_v37 = vpop.f32.mrf.mxu0 }
 0x29c   :  { %v407_v38 = vadd.f32 %v648_v37, %v538_v36 }
 0x29d   :  { %v401_v39 = vpop.f32.mrf.mxu0 }
 0x29e   :  { %v402_v40 = vadd.f32 %v538_v36, %v401_v39  ;;  %v411_v42 = vmax.f32 %v407_v38, 0.0 }
 0x2a0   :  { %v410_v41 = vmax.f32 %v402_v40, 0.0 }
 0x2a2   :  { %681 = vmatprep.mubr.f32.mxu1 %v410_v41 }
 0x2a3   :  { %682 = vmatmul.mubr.f32.vlgmr.msra.gmra.mxu1 %v411_v42 }
 0x363   :  { %v683_v44 = vpop.f32.mrf.mxu1 }
 0x364   :  { %v507_v45 = vadd.f32 %v683_v44, %v539_v43 }
 0x365   :  { %v501_v46 = vpop.f32.mrf.mxu1 }
 0x366   :  { %511 = vst [vmem:[#allocation11 + $0x8] sm:$0xff] %v507_v45  ;;  %v502_v47 = vadd.f32 %v539_v43, %v501_v46 }
 0x368   :  { %510 = vst [vmem:[#allocation11] sm:$0xff] %v502_v47 }
 0x369   :  { %813 = shalt.err (!%p810_p1)
}
 0x36a   :  { %523 = dma.vmem_to_hbm [thread:$0]  %s518_s21, 256, %s945_s9, [#allocation4], %s831_s12, %s831_s12, %s832_s13  }
 0x36b   :  { %828 = dma.done.wait [#allocation4], 256  }
 0x36c   :  { %829 = vsyncadd [#allocation4], 4294967040 }
 0x36d   :  { %527 = vsyncpa [#allocation3], 1 }
 0x36e   :  { %528 = vsyncpa [#allocation6], 1 }
 0x36f   :  { %529 = vsyncpa [#allocation9], 1 }
 0x370   :  { %530 = vsyncpa [#allocation4], 1 }

</bundles_post_ra>
